<compile_context>
chip_gen: v7x
topology: tpu7x:2x2x1
jax: 0.10.0
libtpu: 0.0.40
codegen_flags: <defaults>
</compile_context>

<pallas_src>
import jax
import jax.numpy as jnp
from jax.experimental import pallas as pl
from jax.experimental.pallas import tpu as pltpu


# ---------------------------------------------------------------------------
# Small helpers
# ---------------------------------------------------------------------------

def _cdiv(a, b):
    return -(-a // b)


def _round_up(a, b):
    return _cdiv(a, b) * b


def _vmem_capacity_bytes():
    try:
        return int(pltpu.get_tpu_info().vmem_capacity_bytes)
    except Exception:
        return 64 << 20        # conservative fallback (v7x-sized)


def _vmem_limit_bytes():
    cap = _vmem_capacity_bytes()
    # ~70% of physical VMEM, capped at 96 MiB (v5e/v6e) — ends up ~45 MiB on v7x.
    return max(16 << 20, min(int(cap * 0.7), 96 << 20))


def _pick_l_tile(L, C, vmem_limit):
    """Largest flattened-spatial tile (lanes) such that a (1, C, Lt) f32 block
    keeps the double-buffered pass-2 working set (~16-20 blocks) within the
    scoped-VMEM limit.  Multiple of 1024 lanes when possible (bounded unroll of
    the lane-accumulation loop), else multiple of 128, else the full L."""
    bytes_per_lane = _round_up(C, 8) * 4
    budget = max(256 * 1024, vmem_limit // 20)
    max_lanes = max(128, budget // bytes_per_lane)
    max_lanes = min(max_lanes, 16384)
    if L <= max_lanes:
        return L
    if max_lanes >= 1024:
        return (max_lanes // 1024) * 1024
    return (max_lanes // 128) * 128


# ---------------------------------------------------------------------------
# Kernels
# ---------------------------------------------------------------------------

def _make_fused_kernel(cnt, eps):
    """Single-pass kernel: whole (N, C, L) problem resident in VMEM.
    Computes per-channel biased variance of m = sqrt(u^2+v^2) and normalizes,
    reading u/v from HBM exactly once."""
    inv_cnt = 1.0 / cnt

    def kernel(u_ref, v_ref, u_out_ref, v_out_ref, var_ref):
        u = u_ref[...].astype(jnp.float32)            # (N, C, L)
        v = v_ref[...].astype(jnp.float32)
        sq = u * u + v * v                            # m^2
        m = jnp.sqrt(sq)                              # EUP sqrt
        mean = jnp.sum(m, axis=(0, 2), keepdims=True) * inv_cnt    # (1, C, 1)
        e_m2 = jnp.sum(sq, axis=(0, 2), keepdims=True) * inv_cnt   # (1, C, 1)
        var = jnp.maximum(e_m2 - mean * mean, 0.0)
        inv = jax.lax.rsqrt(eps + var)
        u_out_ref[...] = (u * inv).astype(u_out_ref.dtype)
        v_out_ref[...] = (v * inv).astype(v_out_ref.dtype)
        var_ref[...] = var

    return kernel


def _make_stats_kernel(C, Lt, L, per, Wacc, mask_needed):
    """Streaming per-channel sum(m), sum(m^2) accumulation.

    Grid = (N, S, per) with the L-reduction axis last ("arbitrary").
    Blocks: u_ref / v_ref are (1, C, Lt).  Outputs sum_ref / sumsq_ref are
    (1, C, 1) partials per (n, s) group.  acc_m / acc_sq are lane-dense
    (1, C, Wacc) VMEM scratch: the steady state is pure VPU adds; the single
    cross-lane reduce + narrow store happen only at the last L step."""
    n_slices = Lt // Wacc
    assert n_slices * Wacc == Lt

    def kernel(u_ref, v_ref, sum_ref, sumsq_ref, acc_m, acc_sq):
        l = pl.program_id(2)

        @pl.when(l == 0)
        def _init():
            acc_m[...] = jnp.zeros_like(acc_m)
            acc_sq[...] = jnp.zeros_like(acc_sq)

        u = u_ref[...].astype(jnp.float32)            # (1, C, Lt)
        v = v_ref[...].astype(jnp.float32)
        sq = u * u + v * v                            # m^2 directly
        m = jnp.sqrt(sq)                              # EUP sqrt, off the VALU path

        if mask_needed:
            # Mask out lanes past the true L (ragged last tile / padded groups).
            s = pl.program_id(1)
            base = (s * per + l) * Lt                 # global element offset
            idx = jax.lax.broadcasted_iota(jnp.int32, (1, C, Lt), 2)
            valid = idx < (L - base)
            sq = jnp.where(valid, sq, 0.0)
            m = jnp.where(valid, m, 0.0)

        # Lane-grouped partial sums: vreg-to-vreg VPU adds only.
        p_m = m[:, :, 0:Wacc]
        p_sq = sq[:, :, 0:Wacc]
        for j in range(1, n_slices):
            p_m = p_m + m[:, :, j * Wacc:(j + 1) * Wacc]
            p_sq = p_sq + sq[:, :, j * Wacc:(j + 1) * Wacc]
        acc_m[...] += p_m
        acc_sq[...] += p_sq

        @pl.when(l == pl.num_programs(2) - 1)
        def _flush():
            # One cross-lane reduce + one narrow store per (n, s) group.
            sum_ref[...] = jnp.sum(acc_m[...], axis=2, keepdims=True)
            sumsq_ref[...] = jnp.sum(acc_sq[...], axis=2, keepdims=True)

    return kernel


def _normalize_kernel(u_ref, v_ref, inv_ref, u_out_ref, v_out_ref):
    """Elementwise scale by precomputed per-channel inv = rsqrt(eps + var)."""
    inv = inv_ref[...]                                # (1, C, 1) f32
    u_out_ref[...] = (u_ref[...].astype(jnp.float32) * inv).astype(u_out_ref.dtype)
    v_out_ref[...] = (v_ref[...].astype(jnp.float32) * inv).astype(v_out_ref.dtype)


# ---------------------------------------------------------------------------
# Wrapper
# ---------------------------------------------------------------------------

def vector_batch_norm(u, v, running_var, *, eps=1e-5, momentum=0.5, training=True,
                      l_tile=None, allow_fused=True):
    """u, v: (N, C, H, W).  running_var: (1, C, 1, 1).
    Returns (u_norm, v_norm, new_running_var) matching the PyTorch forward.
    `l_tile` / `allow_fused` are testing/tuning overrides."""
    N, C, H, W = u.shape
    L = H * W
    cnt = float(N * L)

    # Free reshapes only — no transposes, no extra HBM traffic.
    u3 = u.reshape(N, C, L)
    v3 = v.reshape(N, C, L)
    rv = running_var.reshape(C).astype(jnp.float32)

    vmem_limit = _vmem_limit_bytes()

    def cparams(sem):
        return pltpu.CompilerParams(dimension_semantics=sem,
                                    vmem_limit_bytes=vmem_limit)

    # ---------------- fused single-read path (training, VMEM-resident) -------
    fused_bytes = 12 * N * _round_up(C, 8) * _round_up(L, 128) * 4
    if (training and allow_fused and l_tile is None
            and fused_bytes + (1 << 20) <= vmem_limit):
        full_spec = pl.BlockSpec((N, C, L), lambda i: (0, 0, 0))
        u_out, v_out, var3 = pl.pallas_call(
            _make_fused_kernel(cnt, eps),
            grid=(1,),
            in_specs=[full_spec, full_spec],
            out_specs=[full_spec, full_spec,
                       pl.BlockSpec((1, C, 1), lambda i: (0, 0, 0))],
            out_shape=[jax.ShapeDtypeStruct((N, C, L), u.dtype),
                       jax.ShapeDtypeStruct((N, C, L), v.dtype),
                       jax.ShapeDtypeStruct((1, C, 1), jnp.float32)],
            compiler_params=cparams(("arbitrary",)),
        )(u3, v3)
        var = var3.reshape(C)
        new_rv = rv * (1.0 - momentum) + momentum * var * (cnt / (cnt - 1.0))
        return (u_out.reshape(N, C, H, W),
                v_out.reshape(N, C, H, W),
                new_rv.reshape(1, C, 1, 1))

    # ---------------- streaming two-pass path --------------------------------
    Lt = int(l_tile) if l_tile is not None else _pick_l_tile(L, C, vmem_limit)
    n_l = _cdiv(L, Lt)

    io_spec = pl.BlockSpec((1, C, Lt), lambda n, l: (n, 0, l))

    if training:
        # Give v7x's second TensorCore work even when N == 1 by splitting the
        # L tiles into a leading parallel group axis; partials summed below.
        S = 2 if (N == 1 and n_l >= 2) else 1
        per = _cdiv(n_l, S)
        Wacc = 1024 if Lt % 1024 == 0 else (128 if Lt % 128 == 0 else Lt)
        mask_needed = (S * per * Lt != L)
        n_l_max = n_l

        stats_in_spec = pl.BlockSpec(
            (1, C, Lt),
            lambda n, s, l: (n, 0, jnp.minimum(s * per + l, n_l_max - 1)))
        stats_out_spec = pl.BlockSpec((1, C, 1), lambda n, s, l: (n * S + s, 0, 0))

        sum_m_p, sum_sq_p = pl.pallas_call(
            _make_stats_kernel(C, Lt, L, per, Wacc, mask_needed),
            grid=(N, S, per),
            in_specs=[stats_in_spec, stats_in_spec],
            out_specs=[stats_out_spec, stats_out_spec],
            out_shape=[jax.ShapeDtypeStruct((N * S, C, 1), jnp.float32),
                       jax.ShapeDtypeStruct((N * S, C, 1), jnp.float32)],
            scratch_shapes=[pltpu.VMEM((1, C, Wacc), jnp.float32),
                            pltpu.VMEM((1, C, Wacc), jnp.float32)],
            compiler_params=cparams(("parallel", "parallel", "arbitrary")),
        )(u3, v3)

        # Tiny per-channel combine on C scalars (plain-JAX glue).
        # Note: E[m^2] - E[m]^2 in f32 is cancellation-prone for very
        # low-variance channels; the clamp guards against negative values.
        mean = jnp.sum(sum_m_p, axis=(0, 2)) / cnt            # (C,)
        e_m2 = jnp.sum(sum_sq_p, axis=(0, 2)) / cnt           # (C,)
        var = jnp.maximum(e_m2 - mean * mean, 0.0)            # biased variance
        new_rv = rv * (1.0 - momentum) + momentum * var * (cnt / (cnt - 1.0))
    else:
        var = rv
        new_rv = rv

    inv = jax.lax.rsqrt(eps + var).reshape(1, C, 1).astype(jnp.float32)

    # Elementwise normalize; lane-dense tiles, both grid axes parallel,
    # partial last tile handled by clipped writeback.
    u_out, v_out = pl.pallas_call(
        _normalize_kernel,
        grid=(N, n_l),
        in_specs=[io_spec, io_spec,
                  pl.BlockSpec((1, C, 1), lambda n, l: (0, 0, 0))],
        out_specs=[io_spec, io_spec],
        out_shape=[jax.ShapeDtypeStruct((N, C, L), u.dtype),
                   jax.ShapeDtypeStruct((N, C, L), v.dtype)],
        compiler_params=cparams(("parallel", "parallel")),
    )(u3, v3, inv)

    return (u_out.reshape(N, C, H, W),
            v_out.reshape(N, C, H, W),
            new_rv.reshape(1, C, 1, 1))


# ---------------------------------------------------------------------------
# Pure-JAX reference (mirrors the PyTorch training-mode forward)
# ---------------------------------------------------------------------------

def _reference(u, v, running_var, eps=1e-5, momentum=0.5):
    m = jnp.sqrt(u ** 2 + v ** 2)
    mean = jnp.mean(m, axis=(0, 2, 3), keepdims=True)
    var = jnp.mean((m - mean) ** 2, axis=(0, 2, 3), keepdims=True)
    n = u.size / u.shape[1]
    new_rv = running_var * (1 - momentum) + momentum * var * n / (n - 1)
    inv = 1.0 / jnp.sqrt(eps + var)
    return u * inv, v * inv, new_rv


if __name__ == "__main__":
    key = jax.random.PRNGKey(0)
    k_u, k_v, k_u2, k_v2 = jax.random.split(key, 4)

    # ---- Test 1: small shape, training mode -> fused single-pass path ----
    N, C, H, W = 2, 4, 16, 16
    u = jax.random.normal(k_u, (N, C, H, W), dtype=jnp.float32)
    v = jax.random.normal(k_v, (N, C, H, W), dtype=jnp.float32)
    running_var = jnp.ones((1, C, 1, 1), dtype=jnp.float32)
    # Module's `weight` parameter is unused in forward() (matches PyTorch).

    u_out, v_out, new_rv = vector_batch_norm(
        u, v, running_var, eps=1e-5, momentum=0.5, training=True)
    jax.block_until_ready((u_out, v_out, new_rv))

    u_ref, v_ref, rv_ref = _reference(u, v, running_var)
    assert jnp.allclose(u_out, u_ref, atol=1e-4, rtol=1e-4)
    assert jnp.allclose(v_out, v_ref, atol=1e-4, rtol=1e-4)
    assert jnp.allclose(new_rv, rv_ref, atol=1e-4, rtol=1e-4)

    # ---- Test 2: eval mode (uses running_var directly, streaming normalize) ----
    u_e, v_e, rv_e = vector_batch_norm(
        u, v, running_var, eps=1e-5, momentum=0.5, training=False)
    jax.block_until_ready((u_e, v_e, rv_e))
    inv_e = 1.0 / jnp.sqrt(1e-5 + running_var)
    assert jnp.allclose(u_e, u * inv_e, atol=1e-4, rtol=1e-4)
    assert jnp.allclose(v_e, v * inv_e, atol=1e-4, rtol=1e-4)
    assert jnp.allclose(rv_e, running_var, atol=1e-6)

    # ---- Test 3: streaming path with N=1 split-group stats, ragged L,
    #              C not a multiple of 8, masked partial tiles ----
    N2, C2, H2, W2 = 1, 6, 13, 13            # L = 169 (not a multiple of 128)
    u2 = jax.random.normal(k_u2, (N2, C2, H2, W2), dtype=jnp.float32)
    v2 = jax.random.normal(k_v2, (N2, C2, H2, W2), dtype=jnp.float32)
    rv2 = jnp.ones((1, C2, 1, 1), dtype=jnp.float32)

    u2_out, v2_out, rv2_new = vector_batch_norm(
        u2, v2, rv2, eps=1e-5, momentum=0.5, training=True,
        l_tile=128, allow_fused=False)       # force streaming + partial tiles
    jax.block_until_ready((u2_out, v2_out, rv2_new))

    u2_ref, v2_ref, rv2_ref = _reference(u2, v2, rv2)
    assert jnp.allclose(u2_out, u2_ref, atol=1e-4, rtol=1e-4)
    assert jnp.allclose(v2_out, v2_ref, atol=1e-4, rtol=1e-4)
    assert jnp.allclose(rv2_new, rv2_ref, atol=1e-4, rtol=1e-4)

    print("KERNEL_OK")
</pallas_src>

<mosaic_0001>
module attributes {stable_mosaic.version = 11 : i64} {
  func.func @kernel(%arg0: i32, %arg1: memref<2x4x256xf32, #tpu.memory_space<vmem>>, %arg2: memref<2x4x256xf32, #tpu.memory_space<vmem>>, %arg3: memref<2x4x256xf32, #tpu.memory_space<vmem>>, %arg4: memref<2x4x256xf32, #tpu.memory_space<vmem>>, %arg5: memref<1x4x1xf32, #tpu.memory_space<vmem>>) attributes {dimension_semantics = [#tpu.dimension_semantics<arbitrary>], iteration_bounds = array<i64: 1>, scalar_prefetch = 0 : i64, scratch_operands = 0 : i64, tpu.core_type = #tpu.core_type<tc>, window_params = [{pipeline_mode = #tpu.pipeline_mode<synchronous>, transform_indices = @transform_0, window_bounds = array<i64: 2, 4, 256>}, {pipeline_mode = #tpu.pipeline_mode<synchronous>, transform_indices = @transform_1, window_bounds = array<i64: 2, 4, 256>}, {pipeline_mode = #tpu.pipeline_mode<synchronous>, transform_indices = @transform_2, window_bounds = array<i64: 2, 4, 256>}, {pipeline_mode = #tpu.pipeline_mode<synchronous>, transform_indices = @transform_3, window_bounds = array<i64: 2, 4, 256>}, {pipeline_mode = #tpu.pipeline_mode<synchronous>, transform_indices = @transform_4, window_bounds = array<i64: 1, 4, 1>}]} {
    %c0 = arith.constant 0 : index
    %c0_0 = arith.constant 0 : index
    %c0_1 = arith.constant 0 : index
    %0 = vector.load %arg1[%c0, %c0_0, %c0_1] : memref<2x4x256xf32, #tpu.memory_space<vmem>>, vector<2x4x256xf32>
    %c0_2 = arith.constant 0 : index
    %c0_3 = arith.constant 0 : index
    %c0_4 = arith.constant 0 : index
    %1 = vector.load %arg2[%c0_2, %c0_3, %c0_4] : memref<2x4x256xf32, #tpu.memory_space<vmem>>, vector<2x4x256xf32>
    %2 = arith.mulf %0, %0 : vector<2x4x256xf32>
    %3 = arith.mulf %1, %1 : vector<2x4x256xf32>
    %4 = arith.addf %2, %3 : vector<2x4x256xf32>
    %5 = math.sqrt %4 : vector<2x4x256xf32>
    %cst = arith.constant dense<0.000000e+00> : vector<4xf32>
    %6 = vector.multi_reduction <add>, %5, %cst [0, 2] : vector<2x4x256xf32> to vector<4xf32>
    %7 = vector.shape_cast %6 : vector<4xf32> to vector<1x4x1xf32>
    %cst_5 = arith.constant 0.001953125 : f32
    %8 = vector.broadcast %cst_5 : f32 to vector<1x4x1xf32>
    %9 = arith.mulf %7, %8 : vector<1x4x1xf32>
    %cst_6 = arith.constant dense<0.000000e+00> : vector<4xf32>
    %10 = vector.multi_reduction <add>, %4, %cst_6 [0, 2] : vector<2x4x256xf32> to vector<4xf32>
    %11 = vector.shape_cast %10 : vector<4xf32> to vector<1x4x1xf32>
    %cst_7 = arith.constant 0.001953125 : f32
    %12 = vector.broadcast %cst_7 : f32 to vector<1x4x1xf32>
    %13 = arith.mulf %11, %12 : vector<1x4x1xf32>
    %14 = arith.mulf %9, %9 : vector<1x4x1xf32>
    %15 = arith.subf %13, %14 : vector<1x4x1xf32>
    %cst_8 = arith.constant 0.000000e+00 : f32
    %16 = vector.broadcast %cst_8 : f32 to vector<1x4x1xf32>
    %17 = arith.maximumf %15, %16 : vector<1x4x1xf32>
    %cst_9 = arith.constant 9.99999974E-6 : f32
    %18 = vector.broadcast %cst_9 : f32 to vector<1x4x1xf32>
    %19 = arith.addf %18, %17 : vector<1x4x1xf32>
    %20 = math.rsqrt %19 : vector<1x4x1xf32>
    %21 = vector.broadcast %20 : vector<1x4x1xf32> to vector<2x4x256xf32>
    %22 = arith.mulf %0, %21 : vector<2x4x256xf32>
    %c0_10 = arith.constant 0 : index
    %c0_11 = arith.constant 0 : index
    %c0_12 = arith.constant 0 : index
    %23 = vector.load %arg3[%c0_10, %c0_11, %c0_12] : memref<2x4x256xf32, #tpu.memory_space<vmem>>, vector<2x4x256xf32>
    tpu.vector_store %arg3[%c0_10, %c0_11, %c0_12], %22 {strides = array<i32>} : memref<2x4x256xf32, #tpu.memory_space<vmem>>, vector<2x4x256xf32>,
    %24 = vector.broadcast %20 : vector<1x4x1xf32> to vector<2x4x256xf32>
    %25 = arith.mulf %1, %24 : vector<2x4x256xf32>
    %c0_13 = arith.constant 0 : index
    %c0_14 = arith.constant 0 : index
    %c0_15 = arith.constant 0 : index
    %26 = vector.load %arg4[%c0_13, %c0_14, %c0_15] : memref<2x4x256xf32, #tpu.memory_space<vmem>>, vector<2x4x256xf32>
    tpu.vector_store %arg4[%c0_13, %c0_14, %c0_15], %25 {strides = array<i32>} : memref<2x4x256xf32, #tpu.memory_space<vmem>>, vector<2x4x256xf32>,
    %c0_16 = arith.constant 0 : index
    %c0_17 = arith.constant 0 : index
    %c0_18 = arith.constant 0 : index
    %27 = vector.load %arg5[%c0_16, %c0_17, %c0_18] : memref<1x4x1xf32, #tpu.memory_space<vmem>>, vector<1x4x1xf32>
    tpu.vector_store %arg5[%c0_16, %c0_17, %c0_18], %17 {strides = array<i32>} : memref<1x4x1xf32, #tpu.memory_space<vmem>>, vector<1x4x1xf32>,
    return
  }
  func.func @transform_0(%arg0: i32) -> (i32, i32, i32) {
    %c0_i32 = arith.constant 0 : i32
    %c0_i32_0 = arith.constant 0 : i32
    %c0_i32_1 = arith.constant 0 : i32
    %c0_i32_2 = arith.constant 0 : i32
    return %c0_i32, %c0_i32_0, %c0_i32_1 : i32, i32, i32
  }
  func.func @transform_1(%arg0: i32) -> (i32, i32, i32) {
    %c0_i32 = arith.constant 0 : i32
    %c0_i32_0 = arith.constant 0 : i32
    %c0_i32_1 = arith.constant 0 : i32
    %c0_i32_2 = arith.constant 0 : i32
    return %c0_i32, %c0_i32_0, %c0_i32_1 : i32, i32, i32
  }
  func.func @transform_2(%arg0: i32) -> (i32, i32, i32) {
    %c0_i32 = arith.constant 0 : i32
    %c0_i32_0 = arith.constant 0 : i32
    %c0_i32_1 = arith.constant 0 : i32
    %c0_i32_2 = arith.constant 0 : i32
    return %c0_i32, %c0_i32_0, %c0_i32_1 : i32, i32, i32
  }
  func.func @transform_3(%arg0: i32) -> (i32, i32, i32) {
    %c0_i32 = arith.constant 0 : i32
    %c0_i32_0 = arith.constant 0 : i32
    %c0_i32_1 = arith.constant 0 : i32
    %c0_i32_2 = arith.constant 0 : i32
    return %c0_i32, %c0_i32_0, %c0_i32_1 : i32, i32, i32
  }
  func.func @transform_4(%arg0: i32) -> (i32, i32, i32) {
    %c0_i32 = arith.constant 0 : i32
    %c0_i32_0 = arith.constant 0 : i32
    %c0_i32_1 = arith.constant 0 : i32
    %c0_i32_2 = arith.constant 0 : i32
    return %c0_i32, %c0_i32_0, %c0_i32_1 : i32, i32, i32
  }
}

</mosaic_0001>

<bundles_post_ra>
// kernel: tpu_custom_call.1
= control target key start
LH: loop header
LB: loop body
LE: loop exit
PB: predicated region body
PF: predicated region fallthrough
CT: control target
= control target key end

     0   :  { %10 = vsyncpa [#allocation3], 0  ;;  %s402_s0 = inlined_call_operand.hbm [shape: f32[2,4,256], index: 0, kind: input, shape index: {}]   ;;  %s403_s1 = inlined_call_operand.hbm [shape: f32[2,4,256], index: 1, kind: input, shape index: {}]   ;;  %s404_s2 = inlined_call_operand.hbm [shape: f32[2,4,256], index: 2, kind: output, shape index: {0}]   ;;  %s405_s3 = inlined_call_operand.hbm [shape: f32[2,4,256], index: 3, kind: output, shape index: {1}]   ;;  %s406_s4 = inlined_call_operand.vmem [shape: f32[1,4,1], index: 4, kind: output, shape index: {2}]  }
   0x1   :  { %11 = vsyncpa [#allocation6], 0 }
   0x2   :  { %12 = vsyncpa [#allocation4], 0 }
   0x3   :  { %13 = vsyncpa [#allocation9], 0  ;;  %s272_s15 = smov [#allocation2]   ;;  %s176_s19 = scalar_lea.hbm %s402_s0, 256 }
   0x4   :  { %s19_s16 = sshll.u32 %s272_s15, 4  ;;  %p177_p0 = scmp.ne.s32.totalorder %s402_s0, %s176_s19  ;;  %s20_s16 = int_to_ptr.vmem [resolvable:$true] %s19_s16 }
   0x5   :  { %p180_p1 = scmp.lt.u32.totalorder %s176_s19, %s402_s0 }
   0x7   :  { %p182_p2 = pnand %p180_p1, %p177_p0 }
   0x9   :  { %185 = shalt.err (!%p182_p2)
}
   0xa   :  { %s186_s24 = scalar_lea.vmem %s20_s16, 256  ;;  %p191_p4 = scmp.lt.s32.totalorder %s20_s16, %s20_s16 }
   0xb   :  { %p187_p3 = scmp.ne.s32.totalorder %s20_s16, %s186_s24  ;;  %p192_p5 = scmp.lt.s32.totalorder %s186_s24, %s186_s24 }
   0xd   :  { %p193_p6 = por %p192_p5, %p191_p4 }
   0xf   :  { %p194_p7 = pnand %p193_p6, %p187_p3 }
  0x11   :  { %197 = shalt.err (!%p194_p7)
}
  0x12   :  { %s273_s25 = smov 128   ;;  %s274_s26 = smov 8  }
  0x13   :  { %25 = dma.hbm_to_vmem [thread:$0]  %s402_s0, 256, %s20_s16, [#allocation3], %s273_s25, %s273_s25, %s274_s26  }
  0x14   :  { %s275_s29 = smov [#allocation5]   ;;  %s198_s7 = scalar_lea.hbm %s403_s1, 256 }
  0x15   :  { %s31_s30 = sshll.u32 %s275_s29, 4  ;;  %p199_p8 = scmp.ne.s32.totalorder %s403_s1, %s198_s7  ;;  %s32_s30 = int_to_ptr.vmem [resolvable:$true] %s31_s30 }
  0x16   :  { %p202_p9 = scmp.lt.u32.totalorder %s198_s7, %s403_s1 }
  0x18   :  { %p204_p10 = pnand %p202_p9, %p199_p8 }
  0x1a   :  { %207 = shalt.err (!%p204_p10)
}
  0x1b   :  { %s208_s12 = scalar_lea.vmem %s32_s30, 256  ;;  %p213_p12 = scmp.lt.s32.totalorder %s32_s30, %s32_s30 }
  0x1c   :  { %p209_p11 = scmp.ne.s32.totalorder %s32_s30, %s208_s12  ;;  %p214_p13 = scmp.lt.s32.totalorder %s208_s12, %s208_s12 }
  0x1e   :  { %p215_p0 = por %p214_p13, %p213_p12 }
  0x20   :  { %p216_p1 = pnand %p215_p0, %p209_p11 }
  0x22   :  { %219 = shalt.err (!%p216_p1)
}
  0x23   :  { %37 = dma.hbm_to_vmem [thread:$0]  %s403_s1, 256, %s32_s30, [#allocation6], %s273_s25, %s273_s25, %s274_s26  }
  0x24   :  { %264 = dma.done.wait [#allocation3], 256  }
  0x25   :  { %265 = vsyncadd [#allocation3], 4294967040 }
  0x26   :  { %266 = dma.done.wait [#allocation6], 256  }
  0x27   :  { %267 = vsyncadd [#allocation6], 4294967040  ;;  %v334_v0 = vld [vmem:[#allocation2] sm:$0xff]  ;;  %v336_v1 = vld [vmem:[#allocation2 + $0x8] sm:$0xff]  ;;  %vm74_vm4 = vcmask 1043456   ;;  %vm123_vm5 = vcmask 3072   ;;  %v110_v48 = vlaneseq }
  0x28   :  { %v338_v2 = vld [vmem:[#allocation5] sm:$0xff]  ;;  %v340_v3 = vld [vmem:[#allocation5 + $0x8] sm:$0xff]  ;;  %v48_v4 = vmul.f32 %v334_v0, %v334_v0  ;;  %v49_v5 = vmul.f32 %v336_v1, %v336_v1  ;;  %v276_v46 = vmov 839922192   ;;  %s277_s15 = smov [#allocation7]   ;;  %s278_s17 = smov [#allocation8]  }
  0x29   :  { %v50_v6 = vmul.f32 %v338_v2, %v338_v2  ;;  %v51_v7 = vmul.f32 %v340_v3, %v340_v3  ;;  %v108_v47 = vunpack.c.l.s4 %v276_v46  ;;  %v111_v50 = vshrl.u32 %v110_v48, 7  ;;  %s130_s16 = sshll.u32 %s277_s15, 4  ;;  %s142_s18 = sshll.u32 %s278_s17, 4  ;;  %s131_s16 = int_to_ptr.vmem [resolvable:$true] %s130_s16  ;;  %s365_s18 = int_to_ptr.vmem [resolvable:$true] %s142_s18 }
  0x2a   :  { %p225_p3 = scmp.lt.s32.totalorder %s131_s16, %s131_s16 }
  0x2b   :  { %v52_v8 = vadd.f32 %v50_v6, %v48_v4  ;;  %v53_v9 = vadd.f32 %v51_v7, %v49_v5  ;;  %v109_v49 = vunpack.c.0.s8 %v108_v47 }
  0x2d   :  { %170 = vrsqrt.f32 %v52_v8  ;;  %v87_v10 = vcombine.high %v52_v8, %v52_v8  ;;  %vm56_vm0 = vcmp.eq.f32.partialorder %v52_v8, inf  ;;  %v59_v12 = vand.u32 2147483648, %v52_v8 }
  0x2e   :  { %172 = vrsqrt.f32 %v53_v9  ;;  %vm58_vm1 = vcmp.eq.f32.partialorder %v52_v8, 0.0  ;;  %vm63_vm2 = vcmp.eq.f32.partialorder %v53_v9, inf  ;;  %v66_v15 = vand.u32 2147483648, %v53_v9 }
  0x2f   :  { %vm65_vm3 = vcmp.eq.f32.partialorder %v53_v9, 0.0  ;;  %v91_v18 = vsel %vm74_vm4, %v52_v8, 0.0  ;;  %v92_v19 = vsel %vm74_vm4, %v87_v10, 0.0  ;;  %v88_v29 = vcombine.high %v53_v9, %v53_v9 }
  0x30   :  { %v93_v26 = vadd.f32 %v92_v19, %v91_v18  ;;  %v94_v30 = vsel %vm74_vm4, %v53_v9, 0.0  ;;  %v112_v51 = vsub.s32 %v109_v49, %v111_v50 }
  0x31   :  { %v96_v35 = vsel %vm74_vm4, %v88_v29, 0.0 }
  0x32   :  { %v95_v34 = vadd.f32 %v94_v30, %v93_v26 }
  0x34   :  { %v97_v37 = vadd.f32 %v96_v35, %v95_v34 }
  0x37   :  { %v171_v11 = vpop.eup %170 }
  0x38   :  { %v173_v13 = vpop.eup %172  ;;  %v55_v14 = vmul.f32 %v171_v11, %v52_v8 }
  0x39   :  { %v62_v16 = vmul.f32 %v173_v13, %v53_v9 }
  0x3a   :  { %v57_v17 = vsel %vm56_vm0, %v52_v8, %v55_v14 }
  0x3b   :  { %v60_v20 = vsel %vm58_vm1, %v59_v12, %v57_v17  ;;  %v64_v21 = vsel %vm63_vm2, %v53_v9, %v62_v16 }
  0x3c   :  { %v67_v22 = vsel %vm65_vm3, %v66_v15, %v64_v21  ;;  %v70_v23 = vcombine.high %v60_v20, %v60_v20  ;;  %v75_v24 = vsel %vm74_vm4, %v60_v20, 0.0 }
  0x3d   :  { %v71_v25 = vcombine.high %v67_v22, %v67_v22  ;;  %v78_v28 = vsel %vm74_vm4, %v67_v22, 0.0 }
  0x3e   :  { %v76_v27 = vsel %vm74_vm4, %v70_v23, 0.0 }
  0x3f   :  { %v77_v31 = vadd.f32 %v76_v27, %v75_v24  ;;  %v80_v32 = vsel %vm74_vm4, %v71_v25, 0.0 }
  0x41   :  { %v79_v33 = vadd.f32 %v78_v28, %v77_v31 }
  0x43   :  { %v81_v36 = vadd.f32 %v80_v32, %v79_v33 }
  0x45   :  { %82 = vadd.xlane.f32.xlu0 %v81_v36 }
  0x49   :  { %98 = vadd.xlane.f32.xlu0 %v97_v37 }
  0xd2   :  { %v83_v38 = vpop.xlane.xlu0 %82 }
  0xd3   :  { %v84_v39 = vmul.f32 0.001953125, %v83_v38 }
  0xd5   :  { %v101_v41 = vmul.f32 %v84_v39, %v84_v39 }
  0xd6   :  { %v99_v40 = vpop.xlane.xlu0 %98 }
  0xd7   :  { %v100_v42 = vmul.f32 0.001953125, %v99_v40 }
  0xd9   :  { %v102_v43 = vsub.f32 %v100_v42, %v101_v41 }
  0xdb   :  { %v103_v44 = vmax.f32 %v102_v43, 0.0 }
  0xdd   :  { %v104_v45 = vadd.f32 1e-05, %v103_v44  ;;  %124 = vst.msk [vmem:[%s406_s4] sm:$0xf] %vm123_vm5, %v103_v44  ;;  %s220_s4 = scalar_lea.vmem %s131_s16, 256 }
  0xde   :  { %p221_p2 = scmp.ne.s32.totalorder %s131_s16, %s220_s4  ;;  %p226_p4 = scmp.lt.s32.totalorder %s220_s4, %s220_s4 }
  0xdf   :  { %174 = vrsqrt.f32 %v104_v45 }
  0xe0   :  { %p227_p5 = por %p226_p4, %p225_p3 }
  0xe2   :  { %p228_p6 = pnand %p227_p5, %p221_p2 }
  0xe9   :  { %v175_v52 = vpop.eup %174 }
  0xea   :  { %v113_v53 = vrot.slane %v175_v52, %v112_v51 }
  0xec   :  { %v115_v54 = vmul.f32 %v113_v53, %v334_v0  ;;  %v116_v55 = vmul.f32 %v113_v53, %v336_v1  ;;  %v119_v56 = vmul.f32 %v113_v53, %v338_v2  ;;  %v120_v57 = vmul.f32 %v113_v53, %v340_v3 }
  0xee   :  { %117 = vst [vmem:[#allocation7] sm:$0xff] %v115_v54  ;;  %118 = vst [vmem:[#allocation7 + $0x8] sm:$0xff] %v116_v55 }
  0xef   :  { %121 = vst [vmem:[#allocation8] sm:$0xff] %v119_v56  ;;  %122 = vst [vmem:[#allocation8 + $0x8] sm:$0xff] %v120_v57 }
  0xf0   :  { %231 = shalt.err (!%p228_p6)
}
  0xf1   :  { %s232_s21 = scalar_lea.hbm %s404_s2, 256 }
  0xf2   :  { %p233_p7 = scmp.ne.s32.totalorder %s404_s2, %s232_s21  ;;  %p236_p8 = scmp.lt.u32.totalorder %s232_s21, %s404_s2 }
  0xf4   :  { %p238_p9 = pnand %p236_p8, %p233_p7 }
  0xf6   :  { %241 = shalt.err (!%p238_p9)
}
  0xf7   :  { %136 = dma.vmem_to_hbm [thread:$0]  %s131_s16, 256, %s404_s2, [#allocation4], %s273_s25, %s273_s25, %s274_s26  }
  0xf8   :  { %s242_s30 = scalar_lea.vmem %s365_s18, 256  ;;  %p247_p11 = scmp.lt.s32.totalorder %s365_s18, %s365_s18 }
  0xf9   :  { %p243_p10 = scmp.ne.s32.totalorder %s365_s18, %s242_s30  ;;  %p248_p12 = scmp.lt.s32.totalorder %s242_s30, %s242_s30 }
  0xfb   :  { %p249_p13 = por %p248_p12, %p247_p11 }
  0xfd   :  { %p250_p0 = pnand %p249_p13, %p243_p10 }
  0xff   :  { %253 = shalt.err (!%p250_p0)
}
 0x100   :  { %s254_s7 = scalar_lea.hbm %s405_s3, 256 }
 0x101   :  { %p255_p1 = scmp.ne.s32.totalorder %s405_s3, %s254_s7  ;;  %p258_p2 = scmp.lt.u32.totalorder %s254_s7, %s405_s3 }
 0x103   :  { %p260_p3 = pnand %p258_p2, %p255_p1 }
 0x105   :  { %263 = shalt.err (!%p260_p3)
}
 0x106   :  { %148 = dma.vmem_to_hbm [thread:$0]  %s365_s18, 256, %s405_s3, [#allocation9], %s273_s25, %s273_s25, %s274_s26  }
 0x107   :  { %268 = dma.done.wait [#allocation4], 256  }
 0x108   :  { %269 = vsyncadd [#allocation4], 4294967040 }
 0x109   :  { %270 = dma.done.wait [#allocation9], 256  }
 0x10a   :  { %271 = vsyncadd [#allocation9], 4294967040 }
 0x10b   :  { %159 = vsyncpa [#allocation3], 1 }
 0x10c   :  { %160 = vsyncpa [#allocation6], 1 }
 0x10d   :  { %161 = vsyncpa [#allocation4], 1 }
 0x10e   :  { %162 = vsyncpa [#allocation9], 1 }

</bundles_post_ra>
